<compile_context>
chip_gen: v7x
topology: tpu7x:2x2x1
jax: 0.10.0
libtpu: 0.0.40
codegen_flags: <defaults>
</compile_context>

<pallas_src>
import math

import jax
import jax.numpy as jnp
from jax.experimental import pallas as pl
from jax.experimental.pallas import tpu as pltpu

D_MODEL = 20
N_HEADS = 5
D_HEAD = D_MODEL // N_HEADS      # 4
EPS = 1e-6                       # Annotated-Transformer LayerNorm eps


def _subcon_kernel(x_ref, g_ref, bta_ref, wqkv_ref, bqkv_ref, wo_ref, bo_ref,
                   o_ref):
    # Block shapes: x_ref/o_ref (1, S, D); weights are whole (tiny) arrays.
    S, D = x_ref.shape[1], x_ref.shape[2]
    H, dk = N_HEADS, D_HEAD

    x = x_ref[0]                                     # (S, D)

    # --- LayerNorm: a_2 * (x - mean) / (std + eps) + b_2, unbiased std ---
    mean = jnp.mean(x, axis=-1, keepdims=True)
    diff = x - mean
    var = jnp.sum(diff * diff, axis=-1, keepdims=True) * (1.0 / (D - 1))
    # Exact reciprocal on the LN path (feeds every matmul downstream).
    xn = g_ref[...] * (diff / (jnp.sqrt(var) + EPS)) + bta_ref[...]   # (S, D)

    # --- fused QKV: ONE (S, D) x (D, 3*H*dk) MXU matmul + fused bias ---
    qkv = jnp.dot(xn, wqkv_ref[...],
                  preferred_element_type=jnp.float32) + bqkv_ref[...]  # (S, 60)

    # Head-major view via static lane slices (columns packed head-major:
    # head h owns cols [h*3dk : (h+1)*3dk] = [q(4) | k(4) | v(4)]).
    qkv_h = jnp.stack(
        [qkv[:, h * 3 * dk:(h + 1) * 3 * dk] for h in range(H)], axis=0)  # (H, S, 3dk)
    q = qkv_h[:, :, 0:dk]                           # (H, S, dk)
    k = qkv_h[:, :, dk:2 * dk]
    v = qkv_h[:, :, 2 * dk:3 * dk]

    # --- per-batch, head-batched attention (no cross-batch mask needed) ---
    scale = 1.0 / math.sqrt(dk)
    s = jnp.einsum('hsd,htd->hst', q, k,
                   preferred_element_type=jnp.float32) * scale        # (H, S, S)
    s = s - jnp.max(s, axis=-1, keepdims=True)
    p = jnp.exp(s)
    p = p * pl.reciprocal(jnp.sum(p, axis=-1, keepdims=True), approx=True)
    # TODO(synk): attention-weight dropout omitted (eval-mode identity).

    ctx = jnp.einsum('hst,htd->hsd', p, v,
                     preferred_element_type=jnp.float32)              # (H, S, dk)

    # --- output projection, heads reduced by a cheap axis-0 sum ---
    out_h = jnp.einsum('hsd,hde->hse', ctx, wo_ref[...],
                       preferred_element_type=jnp.float32)            # (H, S, D)
    out = jnp.sum(out_h, axis=0) + bo_ref[...]                        # (S, D)

    # residual add; residual dropout omitted (eval-mode identity)
    o_ref[0] = (x + out).astype(o_ref.dtype)


def prepare_params(params):
    """One-time host-side packing: no per-call transposes/concats in the hot path."""
    gamma, beta, wq, bq, wk, bk, wv, bv, wo, bo = params
    D = gamma.shape[0]
    wqT, wkT, wvT = wq.T, wk.T, wv.T                 # (D_in, D_out), cols grouped by head
    w_cols, b_cols = [], []
    for h in range(N_HEADS):
        sl = slice(h * D_HEAD, (h + 1) * D_HEAD)
        w_cols += [wqT[:, sl], wkT[:, sl], wvT[:, sl]]
        b_cols += [bq[sl], bk[sl], bv[sl]]
    w_qkv = jnp.concatenate(w_cols, axis=1)          # (D, 3*H*dk) head-major blocks
    b_qkv = jnp.concatenate(b_cols)[None, :]         # (1, 3*H*dk)
    wo_heads = wo.T.reshape(N_HEADS, D_HEAD, D)      # (H, dk, D)
    return (gamma.reshape(1, D), beta.reshape(1, D),
            w_qkv, b_qkv, wo_heads, bo.reshape(1, D))


def subcon_forward(x, prepared):
    B, S, D = x.shape
    g_row, b_row, w_qkv, b_qkv, wo_heads, bo_row = prepared

    def const_spec(a):
        n = a.ndim
        return pl.BlockSpec(a.shape, lambda b, n=n: (0,) * n)

    return pl.pallas_call(
        _subcon_kernel,
        out_shape=jax.ShapeDtypeStruct((B, S, D), x.dtype),
        grid=(B,),                                   # one batch element per step
        in_specs=[
            pl.BlockSpec((1, S, D), lambda b: (b, 0, 0)),   # x
            const_spec(g_row), const_spec(b_row),           # gamma, beta
            const_spec(w_qkv), const_spec(b_qkv),           # packed QKV weight / bias
            const_spec(wo_heads), const_spec(bo_row),       # packed Wo weight, bias
        ],
        out_specs=pl.BlockSpec((1, S, D), lambda b: (b, 0, 0)),
        compiler_params=pltpu.CompilerParams(
            dimension_semantics=("parallel",)),      # both v7x TensorCores usable
    )(x, g_row, b_row, w_qkv, b_qkv, wo_heads, bo_row)


def subcon_ref(x, params):
    """Pure-JAX reference for correctness checking."""
    gamma, beta, wq, bq, wk, bk, wv, bv, wo, bo = params
    B, S, D = x.shape
    mean = jnp.mean(x, axis=-1, keepdims=True)
    std = jnp.sqrt(jnp.sum((x - mean) ** 2, axis=-1, keepdims=True) / (D - 1))
    xn = gamma * (x - mean) / (std + EPS) + beta
    q, k, v = xn @ wq.T + bq, xn @ wk.T + bk, xn @ wv.T + bv

    def split(t):
        return t.reshape(B, S, N_HEADS, D_HEAD).transpose(0, 2, 1, 3)

    qh, kh, vh = split(q), split(k), split(v)
    s = (qh @ kh.transpose(0, 1, 3, 2)) / math.sqrt(D_HEAD)
    p = jax.nn.softmax(s, axis=-1)
    o = (p @ vh).transpose(0, 2, 1, 3).reshape(B, S, D)
    return x + o @ wo.T + bo


if __name__ == "__main__":
    B, S, D = 2, 8, D_MODEL
    key = jax.random.PRNGKey(0)
    keys = jax.random.split(key, 10)

    x = jax.random.normal(keys[0], (B, S, D), dtype=jnp.float32)

    # Deterministic parameter init (shapes from LayerNorm(20) + 4 Linear(20,20)).
    gamma = jnp.ones((D,), jnp.float32)
    beta = jnp.zeros((D,), jnp.float32)
    wq = 0.1 * jax.random.normal(keys[1], (D, D), jnp.float32)
    bq = 0.01 * jax.random.normal(keys[2], (D,), jnp.float32)
    wk = 0.1 * jax.random.normal(keys[3], (D, D), jnp.float32)
    bk = 0.01 * jax.random.normal(keys[4], (D,), jnp.float32)
    wv = 0.1 * jax.random.normal(keys[5], (D, D), jnp.float32)
    bv = 0.01 * jax.random.normal(keys[6], (D,), jnp.float32)
    wo = 0.1 * jax.random.normal(keys[7], (D, D), jnp.float32)
    bo = 0.01 * jax.random.normal(keys[8], (D,), jnp.float32)
    params = (gamma, beta, wq, bq, wk, bk, wv, bv, wo, bo)

    prepped = prepare_params(params)            # one-time host-side packing
    out = subcon_forward(x, prepped)
    out = jax.block_until_ready(out)

    ref = subcon_ref(x, params)
    assert out.shape == (B, S, D)
    # Tolerance covers the EUP approximate reciprocal on the softmax denominator.
    assert jnp.allclose(out, ref, atol=1e-3, rtol=1e-3), \
        f"max abs err {jnp.max(jnp.abs(out - ref))}"

    print("KERNEL_OK")
</pallas_src>

<mosaic_0001>
module attributes {stable_mosaic.version = 11 : i64} {
  func.func @_subcon_kernel(%arg0: i32, %arg1: memref<1x8x20xf32, #tpu.memory_space<vmem>>, %arg2: memref<1x20xf32, #tpu.memory_space<vmem>>, %arg3: memref<1x20xf32, #tpu.memory_space<vmem>>, %arg4: memref<20x60xf32, #tpu.memory_space<vmem>>, %arg5: memref<1x60xf32, #tpu.memory_space<vmem>>, %arg6: memref<5x4x20xf32, #tpu.memory_space<vmem>>, %arg7: memref<1x20xf32, #tpu.memory_space<vmem>>, %arg8: memref<1x8x20xf32, #tpu.memory_space<vmem>>) attributes {dimension_semantics = [#tpu.dimension_semantics<parallel>], iteration_bounds = array<i64: 2>, scalar_prefetch = 0 : i64, scratch_operands = 0 : i64, tpu.core_type = #tpu.core_type<tc>, window_params = [{transform_indices = @transform_0, window_bounds = array<i64: 1, 8, 20>}, {pipeline_mode = #tpu.pipeline_mode<synchronous>, transform_indices = @transform_1, window_bounds = array<i64: 1, 20>}, {pipeline_mode = #tpu.pipeline_mode<synchronous>, transform_indices = @transform_2, window_bounds = array<i64: 1, 20>}, {pipeline_mode = #tpu.pipeline_mode<synchronous>, transform_indices = @transform_3, window_bounds = array<i64: 20, 60>}, {pipeline_mode = #tpu.pipeline_mode<synchronous>, transform_indices = @transform_4, window_bounds = array<i64: 1, 60>}, {pipeline_mode = #tpu.pipeline_mode<synchronous>, transform_indices = @transform_5, window_bounds = array<i64: 5, 4, 20>}, {pipeline_mode = #tpu.pipeline_mode<synchronous>, transform_indices = @transform_6, window_bounds = array<i64: 1, 20>}, {transform_indices = @transform_7, window_bounds = array<i64: 1, 8, 20>}]} {
    %c0 = arith.constant 0 : index
    %c0_0 = arith.constant 0 : index
    %c0_1 = arith.constant 0 : index
    %0 = vector.load %arg1[%c0, %c0_0, %c0_1] : memref<1x8x20xf32, #tpu.memory_space<vmem>>, vector<1x8x20xf32>
    %1 = vector.shape_cast %0 : vector<1x8x20xf32> to vector<8x20xf32>
    %cst = arith.constant dense<0.000000e+00> : vector<8xf32>
    %2 = vector.multi_reduction <add>, %1, %cst [1] : vector<8x20xf32> to vector<8xf32>
    %3 = vector.shape_cast %2 : vector<8xf32> to vector<8x1xf32>
    %cst_2 = arith.constant 2.000000e+01 : f32
    %4 = vector.broadcast %cst_2 : f32 to vector<8x1xf32>
    %5 = arith.divf %3, %4 : vector<8x1xf32>
    %6 = vector.broadcast %5 : vector<8x1xf32> to vector<8x20xf32>
    %7 = arith.subf %1, %6 : vector<8x20xf32>
    %8 = arith.mulf %7, %7 : vector<8x20xf32>
    %cst_3 = arith.constant dense<0.000000e+00> : vector<8xf32>
    %9 = vector.multi_reduction <add>, %8, %cst_3 [1] : vector<8x20xf32> to vector<8xf32>
    %10 = vector.shape_cast %9 : vector<8xf32> to vector<8x1xf32>
    %cst_4 = arith.constant 0.0526315793 : f32
    %11 = vector.broadcast %cst_4 : f32 to vector<8x1xf32>
    %12 = arith.mulf %10, %11 : vector<8x1xf32>
    %c0_5 = arith.constant 0 : index
    %c0_6 = arith.constant 0 : index
    %13 = vector.load %arg2[%c0_5, %c0_6] : memref<1x20xf32, #tpu.memory_space<vmem>>, vector<1x20xf32>
    %14 = math.sqrt %12 : vector<8x1xf32>
    %cst_7 = arith.constant 9.99999997E-7 : f32
    %15 = vector.broadcast %cst_7 : f32 to vector<8x1xf32>
    %16 = arith.addf %14, %15 : vector<8x1xf32>
    %17 = vector.broadcast %16 : vector<8x1xf32> to vector<8x20xf32>
    %18 = arith.divf %7, %17 : vector<8x20xf32>
    %19 = vector.broadcast %13 : vector<1x20xf32> to vector<8x20xf32>
    %20 = arith.mulf %19, %18 : vector<8x20xf32>
    %c0_8 = arith.constant 0 : index
    %c0_9 = arith.constant 0 : index
    %21 = vector.load %arg3[%c0_8, %c0_9] : memref<1x20xf32, #tpu.memory_space<vmem>>, vector<1x20xf32>
    %22 = vector.broadcast %21 : vector<1x20xf32> to vector<8x20xf32>
    %23 = arith.addf %20, %22 : vector<8x20xf32>
    %c0_10 = arith.constant 0 : index
    %c0_11 = arith.constant 0 : index
    %24 = vector.load %arg4[%c0_10, %c0_11] : memref<20x60xf32, #tpu.memory_space<vmem>>, vector<20x60xf32>
    %cst_12 = arith.constant dense<0.000000e+00> : vector<8x60xf32>
    %25 = tpu.matmul %23, %24, %cst_12 {dimension_numbers = #tpu.dot_dimension_numbers<[1], [0], [0], [1], [0, 0, 1, 1], [], []>} : vector<8x20xf32>, vector<20x60xf32>, vector<8x60xf32> -> vector<8x60xf32>
    %c0_13 = arith.constant 0 : index
    %c0_14 = arith.constant 0 : index
    %26 = vector.load %arg5[%c0_13, %c0_14] : memref<1x60xf32, #tpu.memory_space<vmem>>, vector<1x60xf32>
    %27 = vector.broadcast %26 : vector<1x60xf32> to vector<8x60xf32>
    %28 = arith.addf %25, %27 : vector<8x60xf32>
    %29 = vector.extract_strided_slice %28 {offsets = [0, 0], sizes = [8, 12], strides = [1, 1]} : vector<8x60xf32> to vector<8x12xf32>
    %30 = vector.extract_strided_slice %28 {offsets = [0, 12], sizes = [8, 12], strides = [1, 1]} : vector<8x60xf32> to vector<8x12xf32>
    %31 = vector.extract_strided_slice %28 {offsets = [0, 24], sizes = [8, 12], strides = [1, 1]} : vector<8x60xf32> to vector<8x12xf32>
    %32 = vector.extract_strided_slice %28 {offsets = [0, 36], sizes = [8, 12], strides = [1, 1]} : vector<8x60xf32> to vector<8x12xf32>
    %33 = vector.extract_strided_slice %28 {offsets = [0, 48], sizes = [8, 12], strides = [1, 1]} : vector<8x60xf32> to vector<8x12xf32>
    %34 = vector.shape_cast %29 : vector<8x12xf32> to vector<1x8x12xf32>
    %35 = vector.shape_cast %30 : vector<8x12xf32> to vector<1x8x12xf32>
    %36 = vector.shape_cast %31 : vector<8x12xf32> to vector<1x8x12xf32>
    %37 = vector.shape_cast %32 : vector<8x12xf32> to vector<1x8x12xf32>
    %38 = vector.shape_cast %33 : vector<8x12xf32> to vector<1x8x12xf32>
    %39 = tpu.concatenate %34, %35, %36, %37, %38 in 0 : vector<1x8x12xf32>, vector<1x8x12xf32>, vector<1x8x12xf32>, vector<1x8x12xf32>, vector<1x8x12xf32> -> vector<5x8x12xf32>
    %40 = vector.extract_strided_slice %39 {offsets = [0, 0, 0], sizes = [5, 8, 4], strides = [1, 1, 1]} : vector<5x8x12xf32> to vector<5x8x4xf32>
    %41 = vector.extract_strided_slice %39 {offsets = [0, 0, 4], sizes = [5, 8, 4], strides = [1, 1, 1]} : vector<5x8x12xf32> to vector<5x8x4xf32>
    %42 = vector.extract_strided_slice %39 {offsets = [0, 0, 8], sizes = [5, 8, 4], strides = [1, 1, 1]} : vector<5x8x12xf32> to vector<5x8x4xf32>
    "tpu.trace_start"() <{level = 10 : i32, message = "hsd,htd->hst"}> : () -> ()
    %cst_15 = arith.constant dense<0.000000e+00> : vector<5x8x8xf32>
    %43 = tpu.matmul %40, %41, %cst_15 {dimension_numbers = #tpu.dot_dimension_numbers<[2], [2], [1], [1], [0, 0, 0, 1, 1, 1], [0], [0]>} : vector<5x8x4xf32>, vector<5x8x4xf32>, vector<5x8x8xf32> -> vector<5x8x8xf32>
    "tpu.trace_stop"() : () -> ()
    %cst_16 = arith.constant 5.000000e-01 : f32
    %44 = vector.broadcast %cst_16 : f32 to vector<5x8x8xf32>
    %45 = arith.mulf %43, %44 : vector<5x8x8xf32>
    %cst_17 = arith.constant dense<0xFF800000> : vector<5x8xf32>
    %46 = vector.multi_reduction <maximumf>, %45, %cst_17 [2] : vector<5x8x8xf32> to vector<5x8xf32>
    %47 = vector.shape_cast %46 : vector<5x8xf32> to vector<5x8x1xf32>
    %48 = vector.broadcast %47 : vector<5x8x1xf32> to vector<5x8x8xf32>
    %49 = arith.subf %45, %48 : vector<5x8x8xf32>
    %50 = math.exp %49 : vector<5x8x8xf32>
    %cst_18 = arith.constant dense<0.000000e+00> : vector<5x8xf32>
    %51 = vector.multi_reduction <add>, %50, %cst_18 [2] : vector<5x8x8xf32> to vector<5x8xf32>
    %52 = vector.shape_cast %51 : vector<5x8xf32> to vector<5x8x1xf32>
    %53 = tpu.reciprocal %52 {approx = true} : vector<5x8x1xf32> -> vector<5x8x1xf32>
    %54 = vector.broadcast %53 : vector<5x8x1xf32> to vector<5x8x8xf32>
    %55 = arith.mulf %50, %54 : vector<5x8x8xf32>
    "tpu.trace_start"() <{level = 10 : i32, message = "hst,htd->hsd"}> : () -> ()
    %cst_19 = arith.constant dense<0.000000e+00> : vector<5x8x4xf32>
    %56 = tpu.matmul %55, %42, %cst_19 {dimension_numbers = #tpu.dot_dimension_numbers<[2], [1], [1], [2], [0, 0, 0, 1, 1, 2], [0], [0]>} : vector<5x8x8xf32>, vector<5x8x4xf32>, vector<5x8x4xf32> -> vector<5x8x4xf32>
    "tpu.trace_stop"() : () -> ()
    %c0_20 = arith.constant 0 : index
    %c0_21 = arith.constant 0 : index
    %c0_22 = arith.constant 0 : index
    %57 = vector.load %arg6[%c0_20, %c0_21, %c0_22] : memref<5x4x20xf32, #tpu.memory_space<vmem>>, vector<5x4x20xf32>
    "tpu.trace_start"() <{level = 10 : i32, message = "hsd,hde->hse"}> : () -> ()
    %cst_23 = arith.constant dense<0.000000e+00> : vector<5x8x20xf32>
    %58 = tpu.matmul %56, %57, %cst_23 {dimension_numbers = #tpu.dot_dimension_numbers<[2], [1], [1], [2], [0, 0, 0, 1, 1, 2], [0], [0]>} : vector<5x8x4xf32>, vector<5x4x20xf32>, vector<5x8x20xf32> -> vector<5x8x20xf32>
    "tpu.trace_stop"() : () -> ()
    %cst_24 = arith.constant dense<0.000000e+00> : vector<8x20xf32>
    %59 = vector.multi_reduction <add>, %58, %cst_24 [0] : vector<5x8x20xf32> to vector<8x20xf32>
    %c0_25 = arith.constant 0 : index
    %c0_26 = arith.constant 0 : index
    %60 = vector.load %arg7[%c0_25, %c0_26] : memref<1x20xf32, #tpu.memory_space<vmem>>, vector<1x20xf32>
    %61 = vector.broadcast %60 : vector<1x20xf32> to vector<8x20xf32>
    %62 = arith.addf %59, %61 : vector<8x20xf32>
    %63 = arith.addf %1, %62 : vector<8x20xf32>
    %c0_27 = arith.constant 0 : index
    %c0_28 = arith.constant 0 : index
    %c0_29 = arith.constant 0 : index
    %64 = vector.load %arg8[%c0_27, %c0_28, %c0_29] : memref<1x8x20xf32, #tpu.memory_space<vmem>>, vector<1x8x20xf32>
    %65 = vector.shape_cast %64 : vector<1x8x20xf32> to vector<8x20xf32>
    %66 = vector.shape_cast %63 : vector<8x20xf32> to vector<1x8x20xf32>
    tpu.vector_store %arg8[%c0_27, %c0_28, %c0_29], %66 {strides = array<i32>} : memref<1x8x20xf32, #tpu.memory_space<vmem>>, vector<1x8x20xf32>,
    return
  }
  func.func @transform_0(%arg0: i32) -> (i32, i32, i32) {
    %c0_i32 = arith.constant 0 : i32
    %c0_i32_0 = arith.constant 0 : i32
    %c0_i32_1 = arith.constant 0 : i32
    return %arg0, %c0_i32, %c0_i32_0 : i32, i32, i32
  }
  func.func @transform_1(%arg0: i32) -> (i32, i32) {
    %c0_i32 = arith.constant 0 : i32
    %c0_i32_0 = arith.constant 0 : i32
    %c0_i32_1 = arith.constant 0 : i32
    return %c0_i32, %c0_i32_0 : i32, i32
  }
  func.func @transform_2(%arg0: i32) -> (i32, i32) {
    %c0_i32 = arith.constant 0 : i32
    %c0_i32_0 = arith.constant 0 : i32
    %c0_i32_1 = arith.constant 0 : i32
    return %c0_i32, %c0_i32_0 : i32, i32
  }
  func.func @transform_3(%arg0: i32) -> (i32, i32) {
    %c0_i32 = arith.constant 0 : i32
    %c0_i32_0 = arith.constant 0 : i32
    %c0_i32_1 = arith.constant 0 : i32
    return %c0_i32, %c0_i32_0 : i32, i32
  }
  func.func @transform_4(%arg0: i32) -> (i32, i32) {
    %c0_i32 = arith.constant 0 : i32
    %c0_i32_0 = arith.constant 0 : i32
    %c0_i32_1 = arith.constant 0 : i32
    return %c0_i32, %c0_i32_0 : i32, i32
  }
  func.func @transform_5(%arg0: i32) -> (i32, i32, i32) {
    %c0_i32 = arith.constant 0 : i32
    %c0_i32_0 = arith.constant 0 : i32
    %c0_i32_1 = arith.constant 0 : i32
    %c0_i32_2 = arith.constant 0 : i32
    return %c0_i32, %c0_i32_0, %c0_i32_1 : i32, i32, i32
  }
  func.func @transform_6(%arg0: i32) -> (i32, i32) {
    %c0_i32 = arith.constant 0 : i32
    %c0_i32_0 = arith.constant 0 : i32
    %c0_i32_1 = arith.constant 0 : i32
    return %c0_i32, %c0_i32_0 : i32, i32
  }
  func.func @transform_7(%arg0: i32) -> (i32, i32, i32) {
    %c0_i32 = arith.constant 0 : i32
    %c0_i32_0 = arith.constant 0 : i32
    %c0_i32_1 = arith.constant 0 : i32
    return %arg0, %c0_i32, %c0_i32_0 : i32, i32, i32
  }
}

</mosaic_0001>

<bundles_post_ra>
// kernel: tpu_custom_call.1
= control target key start
LH: loop header
LB: loop body
LE: loop exit
PB: predicated region body
PF: predicated region fallthrough
CT: control target
= control target key end

     0   :  { %12 = vsyncpa [#allocation3], 0  ;;  %s2641_s0 = inlined_call_operand.hbm [shape: f32[2,8,20], index: 0, kind: input, shape index: {}]   ;;  %s2642_s1 = inlined_call_operand.vmem [shape: f32[1,20], index: 1, kind: input, shape index: {}]   ;;  %s2643_s2 = inlined_call_operand.vmem [shape: f32[1,20], index: 2, kind: input, shape index: {}]   ;;  %s2644_s3 = inlined_call_operand.hbm [shape: f32[20,60], index: 3, kind: input, shape index: {}]   ;;  %s2645_s4 = inlined_call_operand.vmem [shape: f32[1,60], index: 4, kind: input, shape index: {}]   ;;  %s2646_s5 = inlined_call_operand.hbm [shape: f32[5,4,20], index: 5, kind: input, shape index: {}]   ;;  %s2647_s6 = inlined_call_operand.vmem [shape: f32[1,20], index: 6, kind: input, shape index: {}]   ;;  %s2648_s7 = inlined_call_operand.hbm [shape: f32[2,8,20], index: 7, kind: output, shape index: {}]  }
   0x1   :  { %14 = vsyncpa [#allocation3 + $0x1], 0 }
   0x2   :  { %15 = vsyncpa [#allocation6], 0 }
   0x3   :  { %16 = vsyncpa [#allocation4], 0 }
   0x4   :  { %18 = vsyncpa [#allocation4 + $0x1], 0  ;;  %s2274_s24 = smov 0   ;;  %s2276_s25 = smov 0  }
   0x5   :  { %s2278_s26 = smov 0   ;;  %s2280_s27 = smov 0  }
   0x6 LB: > { %s2295_s28 = sadd.s32 4294967295, %s2215_s27   ;;  %s1787_s29 = sadd.s32 4294967294, %s2215_s27   ;;  %s2215_s27 = sphi %s2280_s27, %s2668_s27   ;;  %s2211_s26 = sphi %s2278_s26, %s2667_s26   ;;  %s2207_s25 = sphi %s2276_s25, %s2666_s25   ;;  %s2203_s24 = sphi %s2274_s24, %s2665_s24  }
   0x7   : > { %p44_p0 = scmp.ne.s32.totalorder %s2207_s25, %s2203_s24  ;;  %p2649_p1 = scmp.eq.s32.totalorder %s2295_s28, 0 }
   0x8   : > { %p200_p3 = scmp.eq.s32.totalorder %s1787_s29, 1  ;;  %p1788_p5 = scmp.ge.s32.totalorder %s2215_s27, 1 }
   0x9   : > { %p2304_p4 = por %p2649_p1, %p44_p0  ;;  %p207_p7 = scmp.lt.s32.totalorder %s2215_s27, 3 }
   0xa   : > { %p2309_p6 = por %p200_p3, %p44_p0  ;;  %s2217_s10 = smov [#allocation5]  }
   0xb   : > { %s2652_s30 = scalar_select %p2304_p4, 1, 0 }
   0xc   : > { %s2653_s8 = scalar_select %p2309_p6, 1, 0 }
   0xd   : > { %p2314_p8 = pnand %p1788_p5, %p207_p7  ;;  %s225_s11 = sshll.u32 %s2217_s10, 4  ;;  %s2318_s11 = int_to_ptr.vmem [resolvable:$true] %s225_s11 }
   0xe   : > { %s2218_s13 = smov [#allocation7]   ;;  %s2059_s17 = scalar_lea.hbm %s2644_s3, 384 }
   0xf   : > { %p1967_p9 = pneg %p2314_p8  ;;  %s241_s14 = sshll.u32 %s2218_s13, 4  ;;  %s2329_s14 = int_to_ptr.vmem [resolvable:$true] %s241_s14 }
  0x10   : > { %p2060_p12 = scmp.ne.s32.totalorder %s2644_s3, %s2059_s17  ;;  %p2066_p5 = scmp.lt.u32.totalorder %s2059_s17, %s2644_s3 }
  0x11   : > { %p2325_p11 = pnand %p1967_p9, %p2649_p1 }
  0x13   : > { %p2061_p13 = pneg %p2325_p11 }
  0x15   : > { %p2062_p0 = pnand %p2061_p13, %p2060_p12 }
  0x17   : > { %p2063_p3 = pneg %p2062_p0 }
  0x19   : > { %p2068_p7 = pnand %p2066_p5, %p2063_p3 }
  0x1b   : > { %2071 = shalt.err (!%p2068_p7)
}
  0x1c   : > { %s2072_s22 = scalar_lea.vmem %s2318_s11, 384  ;;  %p2080_p2 = scmp.lt.s32.totalorder %s2318_s11, %s2318_s11 }
  0x1d   : > { %p2073_p9 = scmp.ne.s32.totalorder %s2318_s11, %s2072_s22  ;;  %p2081_p12 = scmp.lt.s32.totalorder %s2072_s22, %s2072_s22 }
  0x1f   : > { %p2075_p10 = pnand %p2073_p9, %p2061_p13  ;;  %p2082_p0 = por %p2081_p12, %p2080_p2 }
  0x21   : > { %p2076_p1 = pneg %p2075_p10 }
  0x23   : > { %p2083_p6 = pnand %p2082_p0, %p2076_p1 }
  0x25   : > { %2086 = shalt.err (!%p2083_p6)
}
  0x26   : > { %s2219_s23 = smov 128   ;;  %s2220_s29 = smov 8  }
  0x27   : > { %1970 = dma.hbm_to_vmem [thread:$0]  (!%p2325_p11), %s2644_s3, 384, %s2318_s11, [#allocation6], %s2219_s23, %s2219_s23, %s2220_s29  }
  0x28   : > { %s2087_s17 = scalar_lea.hbm %s2646_s5, 320 }
  0x29   : > { %p2088_p2 = scmp.ne.s32.totalorder %s2646_s5, %s2087_s17  ;;  %p2094_p10 = scmp.lt.u32.totalorder %s2087_s17, %s2646_s5 }
  0x2b   : > { %p2090_p1 = pnand %p2088_p2, %p2061_p13 }
  0x2d   : > { %p2091_p6 = pneg %p2090_p1 }
  0x2f   : > { %p2096_p3 = pnand %p2094_p10, %p2091_p6 }
  0x31   : > { %2099 = shalt.err (!%p2096_p3)
}
  0x32   : > { %s2100_s11 = scalar_lea.vmem %s2329_s14, 320  ;;  %p2108_p12 = scmp.lt.s32.totalorder %s2329_s14, %s2329_s14 }
  0x33   : > { %p2101_p5 = scmp.ne.s32.totalorder %s2329_s14, %s2100_s11  ;;  %p2109_p0 = scmp.lt.s32.totalorder %s2100_s11, %s2100_s11 }
  0x35   : > { %p2103_p7 = pnand %p2101_p5, %p2061_p13  ;;  %p2110_p2 = por %p2109_p0, %p2108_p12 }
  0x37   : > { %p2104_p9 = pneg %p2103_p7 }
  0x39   : > { %p2111_p1 = pnand %p2110_p2, %p2104_p9 }
  0x3b   : > { %2114 = shalt.err (!%p2111_p1)
}
  0x3c   : > { %s2221_s22 = smov 64   ;;  %s2222_s23 = smov 4  }
  0x3d   : > { %1973 = dma.hbm_to_vmem [thread:$0]  (!%p2325_p11), %s2646_s5, 320, %s2329_s14, [#allocation6], %s2221_s22, %s2221_s22, %s2222_s23  }
  0x3e   : > { %s2384_s13 = sadd.s32 1, %s2215_s27   ;;  %s31_s16 = sadd.s32 1, %s2211_s26 }
  0x3f   : > { %s28_s15 = ssub.s32 %s2215_s27, %s2384_s13  ;;  %p38_p6 = scmp.ne.s32.totalorder %s2211_s26, %s2207_s25 }
  0x40   : > { %p29_p13 = scmp.eq.s32.totalorder %s28_s15, 0  ;;  %p39_p10 = scmp.eq.s32.totalorder %s2215_s27, 0 }
  0x41   : > { %p2656_p5 = scmp.eq.s32.totalorder %s2295_s28, 1  ;;  %p1984_p9 = scmp.lt.s32.totalorder %s2215_s27, 2 }
  0x42   : > { %s2393_s17 = scalar_select %p29_p13, %s2211_s26, %s31_s16  }
  0x43   : > { %p40_p3 = por %p39_p10, %p38_p6  ;;  %p2397_p7 = por %p2656_p5, %p38_p6 }
  0x44   : > { %s258_s12 = sand.u32 1, %s2211_s26   ;;  %s1793_s14 = sshll.u32 %s2215_s27, 7 }
  0x45   : > { %s2657_s18 = scalar_select %p2397_p7, 1, 0 }
  0x46   : > { %s1792_s19 = sshll.u32 %s258_s12, 3  ;;  %s2407_s11 = scalar_lea.hbm %s2641_s0, %s1793_s14 }
  0x47   : > { %s262_s22 = scalar_lea.vmem [#allocation2], %s1792_s19  ;;  %p2411_p11 = pnand %p1984_p9, %p40_p3 }
  0x48   : > { %s269_s23 = sshll.u32 %s262_s22, 4  ;;  %s259_s10 = scalar_lea.sflag [#allocation3], %s258_s12  ;;  %s2409_s23 = int_to_ptr.vmem [resolvable:$true] %s269_s23 }
  0x49   : > { %s2115_s15 = scalar_lea.hbm %s2407_s11, 128  ;;  %p2117_p0 = pneg %p2411_p11 }
  0x4a   : > { %p2116_p12 = scmp.ne.s32.totalorder %s2407_s11, %s2115_s15  ;;  %s2120_s14 = scalar_lea.hbm %s2641_s0, 256 }
  0x4b   : > { %p2121_p13 = scmp.lt.u32.totalorder %s2407_s11, %s2641_s0  ;;  %p2122_p6 = scmp.lt.u32.totalorder %s2120_s14, %s2115_s15 }
  0x4c   : > { %p2118_p2 = pnand %p2117_p0, %p2116_p12  ;;  %p2124_p3 = scmp.lt.u32.totalorder %s2115_s15, %s2407_s11 }
  0x4d   : > { %p2123_p10 = por %p2122_p6, %p2121_p13 }
  0x4e   : > { %p2119_p1 = pneg %p2118_p2 }
  0x4f   : > { %p2125_p5 = por %p2124_p3, %p2123_p10 }
  0x51   : > { %p2126_p9 = pnand %p2125_p5, %p2119_p1 }
  0x53   : > { %2129 = shalt.err (!%p2126_p9)
}
  0x54   : > { %s2130_s12 = scalar_lea.vmem %s2409_s23, 128  ;;  %s2223_s22 = smov [#allocation2]  }
  0x55   : > { %p2131_p12 = scmp.ne.s32.totalorder %s2409_s23, %s2130_s12  ;;  %s2135_s16 = sshll.u32 %s2223_s22, 4  ;;  %s2136_s16 = int_to_ptr.vmem [resolvable:$false] %s2135_s16 }
  0x56   : > { %s2137_s19 = scalar_lea.vmem %s2136_s16, 256  ;;  %p2138_p4 = scmp.lt.s32.totalorder %s2409_s23, %s2136_s16 }
  0x57   : > { %p2133_p2 = pnand %p2131_p12, %p2117_p0  ;;  %p2139_p13 = scmp.lt.s32.totalorder %s2137_s19, %s2130_s12 }
  0x59   : > { %p2134_p7 = pneg %p2133_p2  ;;  %p2140_p6 = por %p2139_p13, %p2138_p4 }
  0x5b   : > { %p2141_p10 = pnand %p2140_p6, %p2134_p7 }
  0x5d   : > { %2144 = shalt.err (!%p2141_p10)
}
  0x5e   : > { %1977 = dma.hbm_to_vmem [thread:$0]  (!%p2411_p11), %s2407_s11, 128, %s2409_s23, %s259_s10  }
  0x5f   : > { %278 = sbr.rel (%p2314_p8) target bundleno = 1867 (0x74b), region = 48  ;;  %s2443_s15 = sand.u32 (!%p2314_p8), 1, %s2207_s25  }
  0x60   : > { %s1795_s14 = sshll.u32 (!%p2314_p8), %s2443_s15, 3  ;;  %s281_s20 = scalar_lea.sflag (!%p2314_p8), [#allocation3], %s2443_s15 }
  0x61   : > { %s284_s21 = scalar_lea.vmem (!%p2314_p8), [#allocation2], %s1795_s14  ;;  %p2659_p4 = scmp.ne.s32.totalorder (!%p2314_p8), %s2652_s30, 0 }
  0x66   : > { %2190 = dma.done.wait (%p2659_p4), %s281_s20, 128  }
  0x67   : > { %2192 = vsyncadd (%p2659_p4), %s281_s20, 4294967168  ;;  %p2660_p7 = scmp.eq.s32.totalorder %s2295_s28, 0 }
  0x69   : > { %2194 = dma.done.wait (%p2660_p7), [#allocation6], 704   ;;  %p2661_p8 = pmov %p2660_p7 }
  0x6a   : > { %vm324_vm0 = vcmask 162816   ;;  %v2457_v0 = vld [vmem:[%s284_s21] sm:$0xff]  ;;  %v362_v7 = vld [vmem:[#allocation5] sm:$0xff]  ;;  %v363_v8 = vld [vmem:[#allocation5 + $0x8] sm:$0xff]  ;;  %v2224_v9 = vmov 0.0|0.0   ;;  %v2225_v11 = vmov 0.0  }
  0x6b   : > { %2196 = vsyncadd (%p2661_p8), [#allocation6], 4294966592  ;;  %v325_v1 = vsel %vm324_vm0, %v2457_v0, 0.0  ;;  %1952 = vmatprep.subr.bf16.mxu0 %v2224_v9  ;;  %v1953_v10 = vpack.c.bf16 %v363_v8, %v362_v7  ;;  %1877 = vmatprep.subr.mxu1 %v2225_v11  ;;  %vm2226_vm1 = vmmov 0   ;;  %v364_v12 = vld [vmem:[#allocation5 + $0x10] sm:$0xf] }
  0x6c   : > { %326 = vadd.xlane.f32.xlu0 %v325_v1  ;;  %1874 = vmatprep.mubr.msk.f32.mxu0 %vm2226_vm1, %v2225_v11  ;;  %vm375_vm2 = vcmask 1043456   ;;  %v1799_v22 = vld [vmem:[%s2642_s1] ss:$0 sm:$0xff]  ;;  %s2227_s12 = smov 92   ;;  %s2228_s22 = smov 116   ;;  %vm460_vm5 = vcmask 31744  }
  0x6d   : > { %1879 = vmatprep.mubr.msk.f32.mxu1 %vm2226_vm1, %v2225_v11  ;;  %1954 = vmatpush3.bf16.msra.mxu0 %v1953_v10  ;;  %v1800_v24 = vld [vmem:[%s2643_s2] ss:$0 sm:$0xff]  ;;  %s2229_s16 = smov 104   ;;  %s2230_s19 = smov 80   ;;  %vm844_vm6 = vcmask 64512  }
  0x6e   : > { %1872 = vmatprep.subr.mxu0 %v2225_v11  ;;  %v1801_v27 = vld [vmem:[%s2645_s4] ss:$0 sm:$0xff]  ;;  %s2231_s20 = smov 124   ;;  %s2232_s21 = smov 120  }
  0x6f   : > { %s1831_s11 = sshll.u32 %s2295_s28, 7  ;;  %s322_s23 = scalar_lea.vmem [#allocation8], %s1795_s14 }
  0x70   : > { %s1698_s29 = sshll.u32 %s322_s23, 4  ;;  %p2662_p0 = scmp.ne.s32.totalorder %s2657_s18, 0  ;;  %s2598_s29 = int_to_ptr.vmem [resolvable:$true] %s1698_s29 }
  0x71   : > { %1873 = vmatpush3.msk.msra.mxu0 %vm375_vm2, %v364_v12  ;;  %s2145_s28 = scalar_lea.vmem %s2598_s29, 128  ;;  %s2233_s14 = smov [#allocation8]  }
  0x72   : > { %1887 = vmatprep.subr.mxu0 %v2225_v11  ;;  %p2146_p11 = scmp.ne.s32.totalorder %s2598_s29, %s2145_s28 }
  0x74   : > { %p2147_p1 = pnand %p2146_p11, %p2662_p0 }
  0x76   : > { %p2148_p3 = pneg %p2147_p1 }
  0xf9   : > { %v327_v2 = vpop.xlane.xlu0 %326 }
  0xfa   : > { %v329_v3 = vmul.f32 0.05, %v327_v2 }
  0xfc   : > { %v330_v4 = vsub.f32 %v2457_v0, %v329_v3 }
  0xfe   : > { %v331_v5 = vmul.f32 %v330_v4, %v330_v4 }
 0x100   : > { %v332_v6 = vsel %vm324_vm0, %v331_v5, 0.0 }
 0x101   : > { %333 = vadd.xlane.f32.xlu0 %v332_v6 }
 0x18e   : > { %v334_v13 = vpop.xlane.xlu0 %333 }
 0x18f   : > { %v335_v14 = vmul.f32 0.05263158, %v334_v13 }
 0x191   : > { %2035 = vrsqrt.f32 %v335_v14  ;;  %vm339_vm3 = vcmp.eq.f32.partialorder %v335_v14, inf  ;;  %v342_v17 = vand.u32 2147483648, %v335_v14  ;;  %vm341_vm4 = vcmp.eq.f32.partialorder %v335_v14, 0.0 }
 0x19b   : > { %v2036_v15 = vpop.eup %2035 }
 0x19c   : > { %v338_v16 = vmul.f32 %v2036_v15, %v335_v14 }
 0x19e   : > { %v340_v18 = vsel %vm339_vm3, %v335_v14, %v338_v16 }
 0x19f   : > { %v343_v19 = vsel %vm341_vm4, %v342_v17, %v340_v18 }
 0x1a0   : > { %v344_v20 = vadd.f32 1e-06, %v343_v19 }
 0x1a2   : > { %2037 = vrcp.f32 %v344_v20 }
 0x1ac   : > { %v2038_v21 = vpop.eup %2037 }
 0x1ad   : > { %v346_v23 = vmul.f32 %v2038_v21, %v330_v4 }
 0x1af   : > { %v353_v25 = vmul.f32 %v1799_v22, %v346_v23 }
 0x1b1   : > { %v361_v26 = vadd.f32 %v1800_v24, %v353_v25 }
 0x1b3   : > { %1875 = vmatmul.mubr.msk.f32.vlgmr.msra.gmra.mrb[0].mxu0 %vm324_vm0, %v361_v26 }
 0x1b4   : > { %1889 = vmatprep.mubr.msk.f32.mxu0 %vm2226_vm1, %v2225_v11 }
 0x286   : > { %v445_v28 = vpop.f32.mrb[0].mxu0 }
 0x287   : > { %v2483_v29 = vadd.f32 %v1801_v27, %v445_v28  ;;  %v1876_v30 = vpop.f32.mrb[1].mxu0 }
 0x289   : > { %454 = vrot.lane.b32.xlu0 %v2483_v29, %s2227_s12  ;;  %450 = vrot.lane.b32.xlu1 %v2483_v29, %s2228_s22  ;;  %s2596_s22 = scalar_lea.hbm %s2648_s7, %s1831_s11 }
 0x28d   : > { %452 = vrot.lane.b32.xlu1 %v2483_v29, %s2229_s16  ;;  %s1685_s16 = scalar_lea.sflag [#allocation4], %s2443_s15 }
 0x291   : > { %456 = vrot.lane.b32.xlu1 %v2483_v29, %s2230_s19  ;;  %s2149_s19 = sshll.u32 %s2233_s14, 4  ;;  %s2150_s19 = int_to_ptr.vmem [resolvable:$false] %s2149_s19 }
 0x292   : > { %p2152_p5 = scmp.lt.s32.totalorder %s2598_s29, %s2150_s19 }
 0x295   : > { %458 = vrot.lane.b32.xlu1 %v2483_v29, %s2231_s20 }
 0x2fb   : > { %v451_v31 = vpop.permute.xlu1 %450  ;;  %v2490_v33 = vpop.permute.xlu0 %454 }
 0x2fc   : > { %535 = vrot.lane.b32.xlu1 %v451_v31, %s2231_s20 }
 0x2ff   : > { %v453_v32 = vpop.permute.xlu1 %452 }
 0x300   : > { %611 = vrot.lane.b32.xlu1 %v453_v32, %s2231_s20 }
 0x303   : > { %v2492_v34 = vpop.permute.xlu1 %456 }
 0x304   : > { %687 = vrot.lane.b32.xlu1 %v2490_v33, %s2231_s20 }
 0x307   : > { %v459_v35 = vpop.permute.xlu1 %458 }
 0x308   : > { %763 = vrot.lane.b32.xlu1 %v2492_v34, %s2231_s20  ;;  %1878 = vmatpush3.xpose.msk.msra.mxu1 %vm460_vm5, %v459_v35  ;;  %s2151_s20 = scalar_lea.vmem %s2150_s19, 256 }
 0x309   : > { %1882 = vmatprep.subr.mxu1 %v2225_v11  ;;  %p2153_p9 = scmp.lt.s32.totalorder %s2151_s20, %s2145_s28 }
 0x30b   : > { %1880 = vmatmul.mubr.msk.f32.vlgmr.msra.gmra.mrb[0].mxu1 %vm460_vm5, %v2483_v29  ;;  %p2154_p12 = por %p2153_p9, %p2152_p5 }
 0x30c   : > { %1884 = vmatprep.mubr.msk.f32.mxu1 %vm2226_vm1, %v2225_v11 }
 0x30d   : > { %p2155_p2 = pnand %p2154_p12, %p2148_p3 }
 0x36e   : > { %v536_v36 = vpop.permute.xlu1 %535 }
 0x36f   : > { %1883 = vmatpush3.xpose.msk.msra.mxu1 %vm460_vm5, %v536_v36 }
 0x370   : > { %1892 = vmatprep.subr.mxu1 %v2225_v11 }
 0x372   : > { %1885 = vmatmul.mubr.msk.f32.vlgmr.msra.gmra.mrb[2].mxu1 %vm460_vm5, %v451_v31  ;;  %v612_v37 = vpop.permute.xlu1 %611 }
 0x373   : > { %1888 = vmatpush3.xpose.msk.msra.mxu0 %vm460_vm5, %v612_v37  ;;  %1894 = vmatprep.mubr.msk.f32.mxu1 %vm2226_vm1, %v2225_v11 }
 0x374   : > { %1897 = vmatprep.subr.mxu0 %v2225_v11 }
 0x376   : > { %1890 = vmatmul.mubr.msk.f32.vlgmr.msra.gmra.mrb[2].mxu0 %vm460_vm5, %v453_v32  ;;  %v688_v38 = vpop.permute.xlu1 %687 }
 0x377   : > { %1893 = vmatpush3.xpose.msk.msra.mxu1 %vm460_vm5, %v688_v38  ;;  %1899 = vmatprep.mubr.msk.f32.mxu0 %vm2226_vm1, %v2225_v11 }
 0x378   : > { %1902 = vmatprep.subr.mxu1 %v2225_v11 }
 0x37a   : > { %1895 = vmatmul.mubr.msk.f32.vlgmr.msra.gmra.mrb[4].mxu1 %vm460_vm5, %v2490_v33  ;;  %v764_v39 = vpop.permute.xlu1 %763 }
 0x37b   : > { %1898 = vmatpush3.xpose.msk.msra.mxu0 %vm460_vm5, %v764_v39  ;;  %1904 = vmatprep.mubr.msk.f32.mxu1 %vm2226_vm1, %v2225_v11 }
 0x37c   : > { %1907 = vmatprep.subr.mxu0 %v2225_v11 }
 0x37e   : > { %1900 = vmatmul.mubr.msk.f32.vlgmr.msra.gmra.mrb[4].mxu0 %vm460_vm5, %v2492_v34 }
 0x37f   : > { %1909 = vmatprep.mubr.msk.f32.mxu0 %vm2226_vm1, %v2225_v11 }
 0x3de   : > { %v531_v40 = vpop.f32.mrb[0].mxu1 }
 0x3df   : > { %v839_v41 = vmul.f32 0.5, %v531_v40  ;;  %v1881_v42 = vpop.f32.mrb[1].mxu1 }
 0x3e1   : > { %v845_v43 = vsel %vm844_vm6, %v839_v41, -inf }
 0x3e2   : > { %846 = vmax.xlane.f32.xlu0 %v845_v43 }
 0x445   : > { %v607_v44 = vpop.f32.mrb[2].mxu1 }
 0x446   : > { %v840_v45 = vmul.f32 0.5, %v607_v44  ;;  %v1886_v46 = vpop.f32.mrb[3].mxu1  ;;  %v1281_v44 = vld [vmem:[#allocation7 + $0x4] sm:$0xf] }
 0x448   : > { %v848_v47 = vsel %vm844_vm6, %v840_v45, -inf }
 0x449   : > { %849 = vmax.xlane.f32.xlu1 %v848_v47  ;;  %v683_v48 = vpop.f32.mrb[2].mxu0 }
 0x44a   : > { %v841_v49 = vmul.f32 0.5, %v683_v48  ;;  %v1891_v50 = vpop.f32.mrb[3].mxu0  ;;  %v1283_v48 = vld [vmem:[#allocation7 + $0xc] sm:$0xf] }
 0x44c   : > { %v851_v51 = vsel %vm844_vm6, %v841_v49, -inf }
 0x44d   : > { %v759_v52 = vpop.f32.mrb[4].mxu1  ;;  %852 = vmax.xlane.f32.xlu0 %v851_v51  ;;  %v1284_v51 = vld [vmem:[#allocation7 + $0x10] sm:$0xf] }
 0x44e   : > { %v842_v53 = vmul.f32 0.5, %v759_v52  ;;  %v1896_v54 = vpop.f32.mrb[5].mxu1 }
 0x450   : > { %v854_v55 = vsel %vm844_vm6, %v842_v53, -inf }
 0x451   : > { %855 = vmax.xlane.f32.xlu0 %v854_v55  ;;  %v835_v56 = vpop.f32.mrb[4].mxu0 }
 0x452   : > { %v843_v57 = vmul.f32 0.5, %v835_v56  ;;  %v1901_v58 = vpop.f32.mrb[5].mxu0 }
 0x454   : > { %v857_v59 = vsel %vm844_vm6, %v843_v57, -inf }
 0x455   : > { %858 = vmax.xlane.f32.xlu1 %v857_v59 }
 0x466   : > { %900 = vrot.lane.b32.xlu1 %v2483_v29, %s2232_s21 }
 0x467   : > { %976 = vrot.lane.b32.xlu0 %v451_v31, %s2232_s21 }
 0x46a   : > { %1052 = vrot.lane.b32.xlu1 %v453_v32, %s2232_s21 }
 0x46f   : > { %v847_v60 = vpop.xlane.xlu0 %846 }
 0x470   : > { %v860_v61 = vsub.f32 %v839_v41, %v847_v60  ;;  %v1280_v41 = vld [vmem:[#allocation7] sm:$0xf] }
 0x472   : > { %v865_v62 = vmul.f32 1.442695, %v860_v61 }
 0x474   : > { %2039 = vpow2.f32 %v865_v62 }
 0x47e   : > { %v2040_v63 = vpop.eup %2039 }
 0x47f   : > { %v875_v1 = vsel %vm844_vm6, %v2040_v63, 0.0 }
 0x486   : > { %876 = vadd.xlane.f32.xlu0 %v875_v1 }
 0x4d6   : > { %v850_v2 = vpop.xlane.xlu1 %849 }
 0x4d7   : > { %v861_v3 = vsub.f32 %v840_v45, %v850_v2  ;;  %v1282_v45 = vld [vmem:[#allocation7 + $0x8] sm:$0xf] }
 0x4d9   : > { %v867_v4 = vmul.f32 1.442695, %v861_v3 }
 0x4da   : > { %v853_v5 = vpop.xlane.xlu0 %852 }
 0x4db   : > { %2041 = vpow2.f32 %v867_v4  ;;  %v862_v6 = vsub.f32 %v841_v49, %v853_v5 }
 0x4dd   : > { %v869_v7 = vmul.f32 1.442695, %v862_v6 }
 0x4de   : > { %v856_v8 = vpop.xlane.xlu0 %855 }
 0x4df   : > { %2043 = vpow2.f32 %v869_v7  ;;  %v863_v9 = vsub.f32 %v842_v53, %v856_v8 }
 0x4e1   : > { %v871_v10 = vmul.f32 1.442695, %v863_v9 }
 0x4e2   : > { %v977_v12 = vpop.permute.xlu0 %976  ;;  %v859_v13 = vpop.xlane.xlu1 %858 }
 0x4e3   : > { %2045 = vpow2.f32 %v871_v10  ;;  %v864_v14 = vsub.f32 %v843_v57, %v859_v13  ;;  %1908 = vmatpush3.msra.mxu0 %v977_v12  ;;  %v1829_v12 = vld [vmem:[%s2647_s6] ss:$0 sm:$0xff] }
 0x4e4   : > { %1917 = vmatprep.subr.mxu0 %v2225_v11 }
 0x4e5   : > { %v2042_v15 = vpop.eup %2041  ;;  %v873_v16 = vmul.f32 1.442695, %v864_v14 }
 0x4e6   : > { %v901_v17 = vpop.permute.xlu1 %900  ;;  %v878_v18 = vsel %vm844_vm6, %v2042_v15, 0.0 }
 0x4e7   : > { %2047 = vpow2.f32 %v873_v16  ;;  %879 = vadd.xlane.f32.xlu1 %v878_v18  ;;  %1903 = vmatpush3.msra.mxu1 %v901_v17 }
 0x4e8   : > { %1912 = vmatprep.subr.mxu1 %v2225_v11 }
 0x4e9   : > { %v2044_v19 = vpop.eup %2043 }
 0x4ea   : > { %v881_v20 = vsel %vm844_vm6, %v2044_v19, 0.0  ;;  %v1053_v28 = vpop.permute.xlu1 %1052 }
 0x4eb   : > { %882 = vadd.xlane.f32.xlu0 %v881_v20 }
 0x4ed   : > { %v2046_v21 = vpop.eup %2045 }
 0x4ee   : > { %v884_v22 = vsel %vm844_vm6, %v2046_v21, 0.0 }
 0x4ef   : > { %885 = vadd.xlane.f32.xlu1 %v884_v22 }
 0x4f1   : > { %v2048_v23 = vpop.eup %2047 }
 0x4f2   : > { %v887_v24 = vsel %vm844_vm6, %v2048_v23, 0.0 }
 0x4f3   : > { %888 = vadd.xlane.f32.xlu0 %v887_v24 }
 0x500   : > { %1128 = vrot.lane.b32.xlu1 %v2490_v33, %s2232_s21 }
 0x509   : > { %1204 = vrot.lane.b32.xlu0 %v2492_v34, %s2232_s21 }
 0x513   : > { %v877_v25 = vpop.xlane.xlu0 %876 }
 0x514   : > { %2049 = vrcp.f32 %v877_v25 }
 0x51e   : > { %v2050_v26 = vpop.eup %2049 }
 0x51f   : > { %v895_v27 = vmul.f32 %v2050_v26, %v2040_v63 }
 0x521   : > { %1905 = vmatmul.mubr.msk.f32.vlgmr.msra.gmra.mrb[6].mxu1 %vm844_vm6, %v895_v27 }
 0x522   : > { %1913 = vmatpush3.msra.mxu1 %v1053_v28  ;;  %1914 = vmatprep.mubr.msk.f32.mxu1 %vm2226_vm1, %v2225_v11 }
 0x523   : > { %1922 = vmatprep.subr.mxu1 %v2225_v11 }
 0x574   : > { %v880_v29 = vpop.xlane.xlu1 %879 }
 0x575   : > { %2051 = vrcp.f32 %v880_v29 }
 0x578   : > { %v883_v30 = vpop.xlane.xlu0 %882 }
 0x579   : > { %2053 = vrcp.f32 %v883_v30 }
 0x57c   : > { %v886_v31 = vpop.xlane.xlu1 %885 }
 0x57d   : > { %2055 = vrcp.f32 %v886_v31 }
 0x57f   : > { %v2052_v32 = vpop.eup %2051 }
 0x580   : > { %v896_v33 = vmul.f32 %v2052_v32, %v2042_v15  ;;  %v889_v34 = vpop.xlane.xlu0 %888  ;;  %v1129_v35 = vpop.permute.xlu1 %1128 }
 0x581   : > { %2057 = vrcp.f32 %v889_v34 }
 0x582   : > { %1910 = vmatmul.mubr.msk.f32.vlgmr.msra.gmra.mrb[6].mxu0 %vm844_vm6, %v896_v33 }
 0x583   : > { %v2054_v36 = vpop.eup %2053  ;;  %1918 = vmatpush3.msra.mxu0 %v1129_v35  ;;  %1919 = vmatprep.mubr.msk.f32.mxu0 %vm2226_vm1, %v2225_v11 }
 0x584   : > { %v897_v37 = vmul.f32 %v2054_v36, %v2044_v19  ;;  %v1205_v38 = vpop.permute.xlu0 %1204  ;;  %1927 = vmatprep.subr.mxu0 %v2225_v11 }
 0x586   : > { %1915 = vmatmul.mubr.msk.f32.vlgmr.msra.gmra.mrb[8].mxu1 %vm844_vm6, %v897_v37 }
 0x587   : > { %v2056_v39 = vpop.eup %2055  ;;  %1923 = vmatpush3.msra.mxu1 %v1205_v38  ;;  %1924 = vmatprep.mubr.msk.f32.mxu1 %vm2226_vm1, %v2225_v11 }
 0x588   : > { %v898_v40 = vmul.f32 %v2056_v39, %v2046_v21  ;;  %1932 = vmatprep.subr.mxu1 %v2225_v11 }
 0x58a   : > { %1920 = vmatmul.mubr.msk.f32.vlgmr.msra.gmra.mrb[8].mxu0 %vm844_vm6, %v898_v40 }
 0x58b   : > { %v2058_v42 = vpop.eup %2057  ;;  %1928 = vmatpush3.msk.msra.mxu0 %vm375_vm2, %v1280_v41  ;;  %1929 = vmatprep.mubr.msk.f32.mxu0 %vm2226_vm1, %v2225_v11 }
 0x58c   : > { %v899_v43 = vmul.f32 %v2058_v42, %v2048_v23  ;;  %1937 = vmatprep.subr.mxu0 %v2225_v11 }
 0x58e   : > { %1925 = vmatmul.mubr.msk.f32.vlgmr.msra.gmra.mrb[10].mxu1 %vm844_vm6, %v899_v43 }
 0x58f   : > { %1934 = vmatprep.mubr.msk.f32.mxu1 %vm2226_vm1, %v2225_v11  ;;  %1933 = vmatpush3.msk.msra.mxu1 %vm375_vm2, %v1281_v44 }
 0x590   : > { %1942 = vmatprep.subr.mxu1 %v2225_v11 }
 0x5f4   : > { %v972_v46 = vpop.f32.mrb[6].mxu1 }
 0x5f5   : > { %v1906_v47 = vpop.f32.mrb[7].mxu1  ;;  %1930 = vmatmul.mubr.msk.f32.vlgmr.msra.gmra.mrb[10].mxu0 %vm460_vm5, %v972_v46 }
 0x5f6   : > { %1938 = vmatpush3.msk.msra.mxu0 %vm375_vm2, %v1282_v45  ;;  %1939 = vmatprep.mubr.msk.f32.mxu0 %vm2226_vm1, %v2225_v11 }
 0x5f7   : > { %1947 = vmatprep.subr.mxu0 %v2225_v11 }
 0x655   : > { %v1048_v49 = vpop.f32.mrb[6].mxu0 }
 0x656   : > { %v1911_v50 = vpop.f32.mrb[7].mxu0  ;;  %1935 = vmatmul.mubr.msk.f32.vlgmr.msra.gmra.mrb[12].mxu1 %vm460_vm5, %v1048_v49 }
 0x657   : > { %1943 = vmatpush3.msk.msra.mxu1 %vm375_vm2, %v1283_v48  ;;  %1944 = vmatprep.mubr.msk.f32.mxu1 %vm2226_vm1, %v2225_v11 }
 0x659   : > { %v1124_v52 = vpop.f32.mrb[8].mxu1 }
 0x65a   : > { %v1916_v53 = vpop.f32.mrb[9].mxu1  ;;  %1940 = vmatmul.mubr.msk.f32.vlgmr.msra.gmra.mrb[12].mxu0 %vm460_vm5, %v1124_v52 }
 0x65b   : > { %1948 = vmatpush3.msk.msra.mxu0 %vm375_vm2, %v1284_v51  ;;  %1949 = vmatprep.mubr.msk.f32.mxu0 %vm2226_vm1, %v2225_v11 }
 0x65d   : > { %v1200_v54 = vpop.f32.mrb[8].mxu0 }
 0x65e   : > { %v1921_v55 = vpop.f32.mrb[9].mxu0  ;;  %1945 = vmatmul.mubr.msk.f32.vlgmr.msra.gmra.mrb[14].mxu1 %vm460_vm5, %v1200_v54 }
 0x661   : > { %v1276_v56 = vpop.f32.mrb[10].mxu1 }
 0x662   : > { %v1926_v57 = vpop.f32.mrb[11].mxu1  ;;  %1950 = vmatmul.mubr.msk.f32.vlgmr.msra.gmra.mrb[14].mxu0 %vm460_vm5, %v1276_v56 }
 0x6c8   : > { %v1357_v58 = vpop.f32.mrb[10].mxu0 }
 0x6c9   : > { %v1931_v59 = vpop.f32.mrb[11].mxu0  ;;  %v1665_v61 = vsel %vm324_vm0, %v1357_v58, 0.0 }
 0x729   : > { %v1433_v60 = vpop.f32.mrb[12].mxu1 }
 0x72a   : > { %v1666_v62 = vsel %vm324_vm0, %v1433_v60, 0.0  ;;  %v1936_v63 = vpop.f32.mrb[13].mxu1 }
 0x72b   : > { %v1667_v1 = vadd.f32 %v1666_v62, %v1665_v61 }
 0x72d   : > { %v1509_v11 = vpop.f32.mrb[12].mxu0 }
 0x72e   : > { %v1668_v2 = vsel %vm324_vm0, %v1509_v11, 0.0  ;;  %v1941_v3 = vpop.f32.mrb[13].mxu0 }
 0x72f   : > { %v1669_v4 = vadd.f32 %v1668_v2, %v1667_v1 }
 0x731   : > { %v1585_v5 = vpop.f32.mrb[14].mxu1 }
 0x732   : > { %v1670_v6 = vsel %vm324_vm0, %v1585_v5, 0.0  ;;  %v1946_v7 = vpop.f32.mrb[15].mxu1 }
 0x733   : > { %v1671_v8 = vadd.f32 %v1670_v6, %v1669_v4 }
 0x735   : > { %v1661_v9 = vpop.f32.mrb[14].mxu0 }
 0x736   : > { %v1672_v10 = vsel %vm324_vm0, %v1661_v9, 0.0  ;;  %v1951_v13 = vpop.f32.mrb[15].mxu0 }
 0x737   : > { %v1673_v14 = vadd.f32 %v1672_v10, %v1671_v8 }
 0x739   : > { %v1681_v15 = vadd.f32 %v1829_v12, %v1673_v14 }
 0x73b   : > { %v1682_v16 = vadd.f32 %v1681_v15, %v2457_v0 }
 0x73d   : > { %1683 = vst.msk [vmem:[%s322_s23] sm:$0xff] %vm324_vm0, %v1682_v16 }
 0x73e   : > { %2158 = shalt.err (!%p2155_p2)
}
 0x73f   : > { %s2159_s15 = scalar_lea.hbm %s2596_s22, 128  ;;  %s2163_s9 = scalar_lea.hbm %s2648_s7, 256 }
 0x740   : > { %p2160_p13 = scmp.ne.s32.totalorder %s2596_s22, %s2159_s15  ;;  %p2164_p4 = scmp.lt.u32.totalorder %s2596_s22, %s2648_s7 }
 0x741   : > { %p2165_p7 = scmp.lt.u32.totalorder %s2163_s9, %s2159_s15  ;;  %p2167_p11 = scmp.lt.u32.totalorder %s2159_s15, %s2596_s22 }
 0x742   : > { %p2161_p6 = pnand %p2160_p13, %p2662_p0 }
 0x743   : > { %p2166_p8 = por %p2165_p7, %p2164_p4 }
 0x744   : > { %p2162_p10 = pneg %p2161_p6 }
 0x745   : > { %p2168_p1 = por %p2167_p11, %p2166_p8 }
 0x747   : > { %p2169_p3 = pnand %p2168_p1, %p2162_p10 }
 0x749   : > { %2172 = shalt.err (!%p2169_p3)
}
 0x74a   : > { %1965 = dma.vmem_to_hbm [thread:$0]  (%p2662_p0), %s2598_s29, 128, %s2596_s22, %s1685_s16  }
 0x74b PF: > { %s1710_s10 = sand.u32 1, %s2203_s24   ;;  %p2663_p5 = scmp.ne.s32.totalorder %s2653_s8, 0 }
 0x74c   : > { %p2664_p9 = scmp.ge.s32.totalorder %s2215_s27, 2  ;;  %s1711_s12 = scalar_lea.sflag [#allocation4], %s1710_s10 }
 0x74e   : > { %p1979_p12 = pnand %p2664_p9, %p2663_p5 }
 0x750   : > { %2198 = dma.done.wait (!%p1979_p12), %s1711_s12, 128  }
 0x751   : > { %2200 = vsyncadd (!%p1979_p12), %s1711_s12, 4294967168  ;;  %p21_p2 = scmp.ge.s32.totalorder %s2384_s13, 4   ;;  %s2665_s24 = smov %s2207_s25 }
 0x752   : > { %s2666_s25 = smov %s2211_s26  ;;  %s2667_s26 = smov %s2393_s17 }
 0x753   : > { %s2668_s27 = smov %s2384_s13  ;;  %23 = sbr.rel (!%p21_p2) target bundleno = 6 (0x6), region = 101 }
 0x75a   :  { %1716 = vsyncpa [#allocation3], 1 }
 0x75b   :  { %1718 = vsyncpa [#allocation3 + $0x1], 1 }
 0x75c   :  { %1719 = vsyncpa [#allocation6], 1 }
 0x75d   :  { %1720 = vsyncpa [#allocation4], 1 }
 0x75e   :  { %1722 = vsyncpa [#allocation4 + $0x1], 1 }

</bundles_post_ra>
